<compile_context>
chip_gen: v5e
topology: v5e:2x2
jax: 0.10.0
libtpu: 0.0.40
codegen_flags: <defaults>
</compile_context>

<pallas_src>
import functools

import jax
import jax.numpy as jnp
from jax.experimental import pallas as pl
from jax.experimental.pallas import tpu as pltpu


# ----------------------------- helpers -------------------------------------

def _round_up(x, m):
    return ((x + m - 1) // m) * m


# ----------------------------- Pallas kernel -------------------------------

def _mlp_decoder_kernel(x_ref, w1_ref, b1_ref, w2_ref, b2_ref, o_ref):
    """Fused fc1 + bias + ReLU6 + fc2 + bias on one (C_in, t_hw) pixel block.

    x_ref : (1, C_in,  t_hw)   pixels of one batch element (lanes = pixels)
    w1_ref: (hidden, C_in)     fc1 weight
    b1_ref: (hidden, 1)        fc1 bias (broadcast over lanes)
    w2_ref: (C_out, hidden)    fc2 weight
    b2_ref: (C_out, 1)         fc2 bias
    o_ref : (1, C_out, t_hw)
    """
    x = x_ref[0]                                               # (C_in, t_hw)
    h = jnp.dot(w1_ref[...], x, preferred_element_type=jnp.float32)
    h = h + b1_ref[...]                                        # (hidden, t_hw)
    h = jnp.clip(h, 0.0, 6.0)                                  # ReLU6
    y = jnp.dot(w2_ref[...], h, preferred_element_type=jnp.float32)
    o_ref[0] = (y + b2_ref[...]).astype(o_ref.dtype)


def mlp_decoder_forward(x, params, *, tile_hw=2048):
    """x: (B, C_in, H, W) float32 NCHW -> (B, C_out, H, W)."""
    B, C, H, W = x.shape
    w1 = params['fc1_w']                                       # (hidden, C_in)
    b1 = params['fc1_b'].reshape(-1, 1)                        # (hidden, 1)
    w2 = params['fc2_w']                                       # (C_out, hidden)
    b2 = params['fc2_b'].reshape(-1, 1)                        # (C_out, 1)
    hidden = w1.shape[0]
    c_out = w2.shape[0]

    HW = H * W
    # Lane-dense spatial tiling: tile is a multiple of 128; pad HW up to a
    # whole number of tiles (padded pixels are sliced off before returning).
    t_hw = min(tile_hw, _round_up(HW, 128))
    HWp = _round_up(HW, t_hw)

    xf = x.reshape(B, C, HW)
    if HWp != HW:
        xf = jnp.pad(xf, ((0, 0), (0, 0), (0, HWp - HW)))

    out = pl.pallas_call(
        _mlp_decoder_kernel,
        out_shape=jax.ShapeDtypeStruct((B, c_out, HWp), jnp.float32),
        grid=(B, HWp // t_hw),
        in_specs=[
            pl.BlockSpec((1, C, t_hw), lambda b, j: (b, 0, j)),
            pl.BlockSpec((hidden, C), lambda b, j: (0, 0)),
            pl.BlockSpec((hidden, 1), lambda b, j: (0, 0)),
            pl.BlockSpec((c_out, hidden), lambda b, j: (0, 0)),
            pl.BlockSpec((c_out, 1), lambda b, j: (0, 0)),
        ],
        out_specs=pl.BlockSpec((1, c_out, t_hw), lambda b, j: (b, 0, j)),
        compiler_params=pltpu.CompilerParams(
            dimension_semantics=("parallel", "parallel")),
    )(xf, w1, b1, w2, b2)

    return out[:, :, :HW].reshape(B, c_out, H, W)


# ----------------------------- reference & params ---------------------------

def mlp_decoder_reference(x, params):
    """Pure-JAX reference (same math as the PyTorch module at drop=0)."""
    w1, b1 = params['fc1_w'], params['fc1_b']
    w2, b2 = params['fc2_w'], params['fc2_b']
    h = jnp.einsum('oc,bchw->bohw', w1, x, precision='highest')
    h = jnp.clip(h + b1[None, :, None, None], 0.0, 6.0)
    y = jnp.einsum('oh,bhxy->boxy', w2, h, precision='highest')
    return y + b2[None, :, None, None]


def init_params(key, in_features, hidden_features=None, out_features=None):
    hidden_features = hidden_features or in_features
    out_features = out_features or in_features
    k1, k2, k3, k4 = jax.random.split(key, 4)

    def w(k, shape, scale=0.05):
        return jax.random.normal(k, shape, jnp.float32) * scale

    return dict(
        fc1_w=w(k1, (hidden_features, in_features)),   # Conv2d 1x1 weight
        fc1_b=w(k2, (hidden_features,)),
        fc2_w=w(k3, (out_features, hidden_features)),
        fc2_b=w(k4, (out_features,)),
    )


# ----------------------------- main ------------------------------------------

if __name__ == "__main__":
    in_features, hidden_features = 4, 32          # out_features defaults to in
    B, H, W = 2, 16, 16

    key = jax.random.PRNGKey(0)
    pkey, xkey = jax.random.split(key)
    params = init_params(pkey, in_features, hidden_features)
    x = jax.random.normal(xkey, (B, in_features, H, W), jnp.float32)

    fwd = jax.jit(mlp_decoder_forward)
    y = fwd(x, params)
    jax.block_until_ready(y)

    assert y.shape == (B, in_features, H, W), y.shape
    assert bool(jnp.all(jnp.isfinite(y)))

    y_ref = mlp_decoder_reference(x, params)
    assert bool(jnp.allclose(y, y_ref, atol=2e-3, rtol=2e-3)), (
        float(jnp.max(jnp.abs(y - y_ref))))

    print("KERNEL_OK")
</pallas_src>

<mosaic_0001>
module attributes {stable_mosaic.version = 11 : i64} {
  func.func @_mlp_decoder_kernel(%arg0: i32, %arg1: i32, %arg2: memref<1x4x256xf32, #tpu.memory_space<vmem>>, %arg3: memref<32x4xf32, #tpu.memory_space<vmem>>, %arg4: memref<32x1xf32, #tpu.memory_space<vmem>>, %arg5: memref<4x32xf32, #tpu.memory_space<vmem>>, %arg6: memref<4x1xf32, #tpu.memory_space<vmem>>, %arg7: memref<1x4x256xf32, #tpu.memory_space<vmem>>) attributes {dimension_semantics = [#tpu.dimension_semantics<parallel>, #tpu.dimension_semantics<parallel>], iteration_bounds = array<i64: 2, 1>, scalar_prefetch = 0 : i64, scratch_operands = 0 : i64, tpu.core_type = #tpu.core_type<tc>, window_params = [{transform_indices = @transform_0, window_bounds = array<i64: 1, 4, 256>}, {pipeline_mode = #tpu.pipeline_mode<synchronous>, transform_indices = @transform_1, window_bounds = array<i64: 32, 4>}, {pipeline_mode = #tpu.pipeline_mode<synchronous>, transform_indices = @transform_2, window_bounds = array<i64: 32, 1>}, {pipeline_mode = #tpu.pipeline_mode<synchronous>, transform_indices = @transform_3, window_bounds = array<i64: 4, 32>}, {pipeline_mode = #tpu.pipeline_mode<synchronous>, transform_indices = @transform_4, window_bounds = array<i64: 4, 1>}, {transform_indices = @transform_5, window_bounds = array<i64: 1, 4, 256>}]} {
    %c0 = arith.constant 0 : index
    %c0_0 = arith.constant 0 : index
    %c0_1 = arith.constant 0 : index
    %0 = vector.load %arg2[%c0, %c0_0, %c0_1] : memref<1x4x256xf32, #tpu.memory_space<vmem>>, vector<1x4x256xf32>
    %1 = vector.shape_cast %0 : vector<1x4x256xf32> to vector<4x256xf32>
    %c0_2 = arith.constant 0 : index
    %c0_3 = arith.constant 0 : index
    %2 = vector.load %arg3[%c0_2, %c0_3] : memref<32x4xf32, #tpu.memory_space<vmem>>, vector<32x4xf32>
    %cst = arith.constant dense<0.000000e+00> : vector<32x256xf32>
    %3 = tpu.matmul %2, %1, %cst {dimension_numbers = #tpu.dot_dimension_numbers<[1], [0], [0], [1], [0, 0, 1, 1], [], []>} : vector<32x4xf32>, vector<4x256xf32>, vector<32x256xf32> -> vector<32x256xf32>
    %c0_4 = arith.constant 0 : index
    %c0_5 = arith.constant 0 : index
    %4 = vector.load %arg4[%c0_4, %c0_5] : memref<32x1xf32, #tpu.memory_space<vmem>>, vector<32x1xf32>
    %5 = vector.broadcast %4 : vector<32x1xf32> to vector<32x256xf32>
    %6 = arith.addf %3, %5 : vector<32x256xf32>
    %cst_6 = arith.constant 0.000000e+00 : f32
    %cst_7 = arith.constant 6.000000e+00 : f32
    %7 = vector.broadcast %cst_6 : f32 to vector<32x256xf32>
    %8 = arith.maximumf %7, %6 : vector<32x256xf32>
    %9 = vector.broadcast %cst_7 : f32 to vector<32x256xf32>
    %10 = arith.minimumf %9, %8 : vector<32x256xf32>
    %c0_8 = arith.constant 0 : index
    %c0_9 = arith.constant 0 : index
    %11 = vector.load %arg5[%c0_8, %c0_9] : memref<4x32xf32, #tpu.memory_space<vmem>>, vector<4x32xf32>
    %cst_10 = arith.constant dense<0.000000e+00> : vector<4x256xf32>
    %12 = tpu.matmul %11, %10, %cst_10 {dimension_numbers = #tpu.dot_dimension_numbers<[1], [0], [0], [1], [0, 0, 1, 1], [], []>} : vector<4x32xf32>, vector<32x256xf32>, vector<4x256xf32> -> vector<4x256xf32>
    %c0_11 = arith.constant 0 : index
    %c0_12 = arith.constant 0 : index
    %13 = vector.load %arg6[%c0_11, %c0_12] : memref<4x1xf32, #tpu.memory_space<vmem>>, vector<4x1xf32>
    %14 = vector.broadcast %13 : vector<4x1xf32> to vector<4x256xf32>
    %15 = arith.addf %12, %14 : vector<4x256xf32>
    %c0_13 = arith.constant 0 : index
    %c0_14 = arith.constant 0 : index
    %c0_15 = arith.constant 0 : index
    %16 = vector.load %arg7[%c0_13, %c0_14, %c0_15] : memref<1x4x256xf32, #tpu.memory_space<vmem>>, vector<1x4x256xf32>
    %17 = vector.shape_cast %16 : vector<1x4x256xf32> to vector<4x256xf32>
    %18 = vector.shape_cast %15 : vector<4x256xf32> to vector<1x4x256xf32>
    tpu.vector_store %arg7[%c0_13, %c0_14, %c0_15], %18 {strides = array<i32>} : memref<1x4x256xf32, #tpu.memory_space<vmem>>, vector<1x4x256xf32>,
    return
  }
  func.func @transform_0(%arg0: i32, %arg1: i32) -> (i32, i32, i32) {
    %c0_i32 = arith.constant 0 : i32
    %c0_i32_0 = arith.constant 0 : i32
    return %arg0, %c0_i32, %arg1 : i32, i32, i32
  }
  func.func @transform_1(%arg0: i32, %arg1: i32) -> (i32, i32) {
    %c0_i32 = arith.constant 0 : i32
    %c0_i32_0 = arith.constant 0 : i32
    %c0_i32_1 = arith.constant 0 : i32
    return %c0_i32, %c0_i32_0 : i32, i32
  }
  func.func @transform_2(%arg0: i32, %arg1: i32) -> (i32, i32) {
    %c0_i32 = arith.constant 0 : i32
    %c0_i32_0 = arith.constant 0 : i32
    %c0_i32_1 = arith.constant 0 : i32
    return %c0_i32, %c0_i32_0 : i32, i32
  }
  func.func @transform_3(%arg0: i32, %arg1: i32) -> (i32, i32) {
    %c0_i32 = arith.constant 0 : i32
    %c0_i32_0 = arith.constant 0 : i32
    %c0_i32_1 = arith.constant 0 : i32
    return %c0_i32, %c0_i32_0 : i32, i32
  }
  func.func @transform_4(%arg0: i32, %arg1: i32) -> (i32, i32) {
    %c0_i32 = arith.constant 0 : i32
    %c0_i32_0 = arith.constant 0 : i32
    %c0_i32_1 = arith.constant 0 : i32
    return %c0_i32, %c0_i32_0 : i32, i32
  }
  func.func @transform_5(%arg0: i32, %arg1: i32) -> (i32, i32, i32) {
    %c0_i32 = arith.constant 0 : i32
    %c0_i32_0 = arith.constant 0 : i32
    return %arg0, %c0_i32, %arg1 : i32, i32, i32
  }
}

</mosaic_0001>

<bundles_post_ra>
// kernel: mlp_decoder_forward.1
= control target key start
LH: loop header
LB: loop body
LE: loop exit
PB: predicated region body
PF: predicated region fallthrough
CT: control target
= control target key end

     0   :  { %s643_s18 = smov 0   ;;  %s645_s19 = smov 0   ;;  %s726_s0 = inlined_call_operand.vmem [shape: f32[2,4,256], index: 0, kind: input, shape index: {}]   ;;  %s727_s1 = inlined_call_operand.vmem [shape: f32[32,4], index: 1, kind: input, shape index: {}]   ;;  %s728_s2 = inlined_call_operand.vmem [shape: f32[32,1], index: 2, kind: input, shape index: {}]   ;;  %s729_s3 = inlined_call_operand.vmem [shape: f32[4,32], index: 3, kind: input, shape index: {}]   ;;  %s730_s4 = inlined_call_operand.vmem [shape: f32[4,1], index: 4, kind: input, shape index: {}]   ;;  %s731_s5 = inlined_call_operand.vmem [shape: f32[2,4,256], index: 5, kind: output, shape index: {}]  }
   0x1   :  { %s647_s20 = smov 0  }
   0x2 LB: > { %s27_s21 = sadd.s32 1, %s606_s19  ;;  %p537_p0 = scmp.ge.s32.totalorder %s610_s20, 1  ;;  %s610_s20 = sphi %s647_s20, %s15_s20   ;;  %s606_s19 = sphi %s645_s19, %s733_s19   ;;  %s602_s18 = sphi %s643_s18, %s732_s18  }
   0x3   : > { %p29_p1 = scmp.ge.s32.totalorder %s27_s21, 2  ;;  %p208_p2 = scmp.lt.s32.totalorder %s610_s20, 3 }
   0x5   : > { %s735_s21 = smov (%p29_p1, %s27_s21), 0  ;;  %p209_p3 = pnand %p537_p0, %p208_p2 }
   0x6   : > { %p245_p4 = scmp.lt.s32.totalorder (!%p209_p3), %s602_s18, 1 }
   0x7   : > { %212 = sbr.rel (%p209_p3) target bundleno = 317 (0x13d), region = 40 }
   0xc   : > { %v612_v0 = vmov 0   ;;  %v270_v1 = vld [vmem:[%s728_s2 + $0x8] sm:$0xff]  ;;  %v272_v2 = vld [vmem:[%s728_s2 + $0x18] sm:$0xff]  ;;  %s737_s18 = smov (!%p245_p4, %s602_s18), 1  ;;  %v269_v4 = vld [vmem:[%s728_s2] sm:$0xff]  ;;  %vm310_vm0 = vcmask 1043456  }
   0xd   : > { %586 = vset.pattern.permute.xlu1 %v612_v0  ;;  %585 = vset.pattern.permute.xlu0 %v612_v0  ;;  %s556_s26 = sshll.u32 %s737_s18, 3  ;;  %v271_v5 = vld [vmem:[%s728_s2 + $0x10] sm:$0xff]  ;;  %v265_v6 = vld [vmem:[%s727_s1] sm:$0xff]  ;;  %vm297_vm1 = vcmask 31744   ;;  %v268_v9 = vld [vmem:[%s727_s1 + $0x18] sm:$0xff]  ;;  %vm396_vm2 = vcmask 261120  }
   0xe   : > { %280 = vperm.xlu1 %586, %v270_v1   ;;  %290 = vperm.xlu0 %585, %v272_v2   ;;  %s252_s29 = scalar_lea.vmem %s726_s0, %s556_s26  ;;  %v266_v10 = vld [vmem:[%s727_s1 + $0x8] sm:$0xff]  ;;  %v267_v11 = vld [vmem:[%s727_s1 + $0x10] sm:$0xff]  ;;  %v390_v12 = vld [vmem:[%s730_s4] sm:$0xf]  ;;  %s262_s28 = scalar_lea.vmem %s731_s5, %s556_s26 }
   0xf   : > { %587 = vset.pattern.permute.xlu2 %v612_v0  ;;  %v264_v3 = vld [vmem:[%s252_s29] sm:$0xff] }
  0x10   : > { %294 = vst [vmem:[#allocation1] ss:$2 sm:$0xff] %v264_v3  ;;  %393 = vperm.xlu2 %587, %v390_v12   ;;  %v389_v48 = vld [vmem:[%s729_s3] sm:$0xf] }
  0x16   : > { %275 = vperm.xlu1 %586, %v269_v4   ;;  %285 = vperm.xlu0 %585, %v271_v5  }
  0x17   : > { %v295_v7 = vld.sshfl [vmem:[#allocation1] sm:$0xff pattern:$0x75316420]  ;;  %v296_v8 = vld.sshfl [vmem:[#allocation1 + $0x8] sm:$0xff pattern:$0x75316420] }
  0x18   : > { %542 = vmatpush.msk.msra.mxu0 %vm310_vm0, %v295_v7  ;;  %547 = vmatpush.msk.msra.mxu1 %vm310_vm0, %v296_v8 }
  0x19   : > { %543 = vmatmul.msk.f32.vlgmr.msra.gmra.mxu0 %vm297_vm1, %v265_v6  ;;  %548 = vmatmul.msk.f32.vlgmr.msra.gmra.mxu1 %vm297_vm1, %v265_v6 }
  0x1a   : > { %558 = vmatpush.msk.msra.mxu2 %vm310_vm0, %v295_v7  ;;  %559 = vmatpush.msk.msra.mxu3 %vm310_vm0, %v296_v8 }
  0x1b   : > { %546 = vmatmul.msk.f32.vlgmr.msra.gmra.mxu2 %vm297_vm1, %v268_v9  ;;  %551 = vmatmul.msk.f32.vlgmr.msra.gmra.mxu3 %vm297_vm1, %v268_v9 }
  0x21   : > { %544 = vmatmul.msk.f32.gmra.mxu0 %vm297_vm1, %v266_v10  ;;  %549 = vmatmul.msk.f32.gmra.mxu1 %vm297_vm1, %v266_v10 }
  0x29   : > { %545 = vmatmul.msk.f32.gmra.mxu0 %vm297_vm1, %v267_v11  ;;  %550 = vmatmul.msk.f32.gmra.mxu1 %vm297_vm1, %v267_v11 }
  0x6a   : > { %v394_v50 = vpop.permute.xlu2 %393 }
  0x80   : > { %v281_v15 = vpop.permute.xlu1 %280  ;;  %v291_v16 = vpop.permute.xlu0 %290 }
  0x88   : > { %v276_v27 = vpop.permute.xlu1 %275  ;;  %v286_v29 = vpop.permute.xlu0 %285 }
  0x96   : > { %v332_v13 = vpop.f32.mrf.mxu0  ;;  %v361_v14 = vpop.f32.mrf.mxu1 }
  0x97   : > { %v333_v32 = vadd.f32 %v332_v13, %v276_v27  ;;  %v362_v35 = vadd.f32 %v361_v14, %v276_v27 }
  0x99   : > { %v373_v41 = vmax.f32 %v333_v32, 0.0  ;;  %v374_v43 = vmax.f32 %v362_v35, 0.0 }
  0x9b   : > { %v381_v47 = vmin.f32 %v373_v41, 6.0  ;;  %v382_v49 = vmin.f32 %v374_v43, 6.0 }
  0x9e   : > { %v335_v17 = vpop.f32.mrf.mxu0  ;;  %v341_v18 = vpop.f32.mrf.mxu2 }
  0x9f   : > { %v342_v19 = vadd.f32 %v341_v18, %v291_v16  ;;  %v364_v20 = vpop.f32.mrf.mxu1  ;;  %v370_v21 = vpop.f32.mrf.mxu3  ;;  %v336_v28 = vadd.f32 %v335_v17, %v281_v15 }
  0xa0   : > { %v371_v22 = vadd.f32 %v370_v21, %v291_v16  ;;  %v365_v30 = vadd.f32 %v364_v20, %v281_v15 }
  0xa1   : > { %v379_v23 = vmax.f32 %v342_v19, 0.0  ;;  %v375_v37 = vmax.f32 %v336_v28, 0.0 }
  0xa2   : > { %v380_v24 = vmax.f32 %v371_v22, 0.0  ;;  %v376_v39 = vmax.f32 %v365_v30, 0.0 }
  0xa3   : > { %v387_v25 = vmin.f32 %v379_v23, 6.0  ;;  %v383_v45 = vmin.f32 %v375_v37, 6.0 }
  0xa4   : > { %v388_v26 = vmin.f32 %v380_v24, 6.0  ;;  %v384_v46 = vmin.f32 %v376_v39, 6.0 }
  0xa5   : > { %412 = vmatpush.msrb.mxu2 %v387_v25 }
  0xa6   : > { %432 = vmatpush.msrb.mxu3 %v388_v26  ;;  %v338_v31 = vpop.f32.mrf.mxu0 }
  0xa7   : > { %v339_v33 = vadd.f32 %v338_v31, %v286_v29  ;;  %v367_v34 = vpop.f32.mrf.mxu1 }
  0xa8   : > { %v368_v36 = vadd.f32 %v367_v34, %v286_v29 }
  0xa9   : > { %v377_v38 = vmax.f32 %v339_v33, 0.0 }
  0xaa   : > { %v378_v40 = vmax.f32 %v368_v36, 0.0 }
  0xab   : > { %v385_v42 = vmin.f32 %v377_v38, 6.0 }
  0xac   : > { %v386_v44 = vmin.f32 %v378_v40, 6.0 }
  0xad   : > { %413 = vmatpush.msrb.mxu2 %v385_v42 }
  0xae   : > { %433 = vmatpush.msrb.mxu3 %v386_v44 }
  0xaf   : > { %414 = vmatpush.msrb.mxu2 %v383_v45 }
  0xb0   : > { %434 = vmatpush.msrb.mxu3 %v384_v46 }
  0xb1   : > { %415 = vmatpush.msrb.mxu2 %v381_v47 }
  0xb2   : > { %435 = vmatpush.msrb.mxu3 %v382_v49  ;;  %552 = vmatmul.msk.f32.vlgmr.msrb.gmra.mxu2 %vm396_vm2, %v389_v48 }
  0xb3   : > { %553 = vmatmul.msk.f32.vlgmr.msrb.gmra.mxu3 %vm396_vm2, %v389_v48 }
 0x135   : > { %v417_v52 = vpop.f32.mrf.mxu2 }
 0x136   : > { %v437_v51 = vpop.f32.mrf.mxu3  ;;  %v418_v55 = vadd.f32 %v417_v52, %v394_v50 }
 0x137   : > { %v438_v53 = vadd.f32 %v437_v51, %v394_v50 }
 0x139   : > { %v442_v54 = vrot.slane %v438_v53, 4 }
 0x13b   : > { %v443_v56 = vsel %vm310_vm0, %v418_v55, %v442_v54 }
 0x13c   : > { %445 = vst [vmem:[%s262_s28] sm:$0xff] %v443_v56 }
 0x13d PF: > { %s15_s20 = sadd.s32 1, %s610_s20   ;;  %s732_s18 = smov %s606_s19 }
 0x13e   : > { %p12_p5 = scmp.ge.s32.totalorder %s15_s20, 4   ;;  %s733_s19 = smov %s735_s21 }
 0x140   :  { %14 = sbr.rel (!%p12_p5) target bundleno = 2 (0x2), region = 70 }

</bundles_post_ra>
